<compile_context>
chip_gen: v5e
topology: v5e:2x2
jax: 0.10.0
libtpu: 0.0.40
codegen_flags: <defaults>
</compile_context>

<pallas_src>
import jax
import jax.numpy as jnp
from jax.experimental import pallas as pl
from jax.experimental.pallas import tpu as pltpu


def _hbm_copy_kernel(x_ref, o_ref, sem):
    # Direct HBM -> HBM DMA of the whole (b, 4096) array.
    # No VMEM staging, no vector load/store work, no pipeline bubbles.
    cp = pltpu.make_async_copy(x_ref, o_ref, sem)
    cp.start()
    cp.wait()


def reshape_4096_to_64x64(x: jax.Array, *, force_copy: bool = False) -> jax.Array:
    """Equivalent of torch: x.view(-1, 1, 64, 64).

    Default path is a free, metadata-only reshape (exactly what .view is).
    `force_copy=True` materializes the result with a Pallas HBM->HBM DMA copy.
    """
    total = x.size
    assert total % 4096 == 0, "input element count must be divisible by 4096"
    b = total // 4096

    if not force_copy:
        # Metadata-only, row-major reshape == torch .view semantics. 0 bytes moved.
        return x.reshape(b, 1, 64, 64)

    # Lane-dense 2D layout for the copy (free metadata reshape; 4096 = 32*128
    # lanes so the HBM rows are fully contiguous).
    x_flat = x.reshape(b, 4096)
    itemsize = jnp.dtype(x.dtype).itemsize

    out_flat = pl.pallas_call(
        _hbm_copy_kernel,
        out_shape=jax.ShapeDtypeStruct((b, 4096), x.dtype),
        # Raw HBM refs on both sides: no auto-DMA into VMEM, no VMEM limit
        # sensitivity on any TPU generation (v5e 16 MiB / v6e 32 MiB scoped
        # defaults, v7x 64 MiB physical VMEM are all irrelevant here).
        in_specs=[pl.BlockSpec(memory_space=pl.ANY)],
        out_specs=pl.BlockSpec(memory_space=pl.ANY),
        scratch_shapes=[pltpu.SemaphoreType.DMA(())],
        cost_estimate=pl.CostEstimate(
            flops=0,
            transcendentals=0,
            bytes_accessed=2 * b * 4096 * itemsize,
        ),
    )(x_flat)

    # Final NCHW-style view: free metadata-only reshape.
    return out_flat.reshape(b, 1, 64, 64)


if __name__ == "__main__":
    key = jax.random.PRNGKey(0)
    # Small shape consistent with the module: a (2, 4, 32, 32) NCHW tensor has
    # 4096 elements per batch item -> output (2, 1, 64, 64).
    x = jax.random.normal(key, (2, 4, 32, 32), dtype=jnp.float32)

    y_ref = x.reshape(-1, 1, 64, 64)

    # Default (recommended) path: zero-cost metadata reshape.
    y_view = jax.block_until_ready(reshape_4096_to_64x64(x))

    # Forced-copy path: exercises the Pallas HBM->HBM DMA kernel.
    y_copy = jax.block_until_ready(reshape_4096_to_64x64(x, force_copy=True))

    assert y_view.shape == (2, 1, 64, 64), y_view.shape
    assert y_copy.shape == (2, 1, 64, 64), y_copy.shape
    assert y_copy.dtype == x.dtype
    assert jnp.array_equal(y_view, y_ref), "view path mismatch vs reference"
    assert jnp.array_equal(y_copy, y_ref), "copy kernel mismatch vs reference"

    print("KERNEL_OK")
</pallas_src>

<mosaic_0001>
module attributes {stable_mosaic.version = 11 : i64} {
  func.func @_hbm_copy_kernel(%arg0: memref<2x4096xf32, #tpu.memory_space<any>>, %arg1: memref<2x4096xf32, #tpu.memory_space<any>>, %arg2: memref<!tpu.dma_semaphore, #tpu.memory_space<semaphore_mem>>) attributes {dimension_semantics = [], scalar_prefetch = 0 : i64, scratch_operands = 1 : i64, tpu.core_type = #tpu.core_type<tc>} {
    tpu.enqueue_dma source(%arg0 : memref<2x4096xf32, #tpu.memory_space<any>>) target(%arg1 : memref<2x4096xf32, #tpu.memory_space<any>>) target_semaphore(%arg2 : memref<!tpu.dma_semaphore, #tpu.memory_space<semaphore_mem>>)
    tpu.wait_dma2 semaphore(%arg2 : memref<!tpu.dma_semaphore, #tpu.memory_space<semaphore_mem>>) src(%arg0 : memref<2x4096xf32, #tpu.memory_space<any>>) dst(%arg1 : memref<2x4096xf32, #tpu.memory_space<any>>)
    return
  }
}

</mosaic_0001>

<bundles_post_ra>
// kernel: tpu_custom_call.1
= control target key start
LH: loop header
LB: loop body
LE: loop exit
PB: predicated region body
PF: predicated region fallthrough
CT: control target
= control target key end

     0   :  { %s33_s12 = smov [#allocation2]   ;;  %s34_s13 = smov [#allocation3]   ;;  %s52_s0 = inlined_call_operand.hbm [shape: f32[2,4096], index: 0, kind: input, shape index: {}]   ;;  %s53_s1 = inlined_call_operand.hbm [shape: f32[2,4096], index: 1, kind: output, shape index: {}]  }
   0x1   :  { %s10_s8 = sshll.u32 %s52_s0, 4  ;;  %s12_s11 = sshll.u32 %s53_s1, 4  ;;  %s11_s8 = int_to_ptr.hbm [resolvable:$true] %s10_s8  ;;  %s13_s11 = int_to_ptr.hbm [resolvable:$true] %s12_s11 }
   0x2   :  { %s35_s14 = smov 0  }
   0x3   :  { %16 = dma.general %s11_s8, 1024, %s13_s11, %s33_s12, %s34_s13, [#allocation4], %s35_s14, 0  }
   0x4   :  { %31 = dma.done.wait [#allocation2], 1024 }
   0x5   :  { %32 = vsyncadd [#allocation2], 4294966272 }
   0x6   :  { %21 = vsyncmov [#allocation2] }
   0x9   :  { %s22_s15 = vpop.sfrf %21 }
   0xa   :  { %p27_p0 = scmp.ne.s32.totalorder %s22_s15, 0 }
   0xc   :  { %26 = shalt.err (%p27_p0)  }

</bundles_post_ra>
